<compile_context>
chip_gen: v5e
topology: v5e:2x2
jax: 0.10.0
libtpu: 0.0.40
codegen_flags: <defaults>
</compile_context>

<pallas_src>
import jax
import jax.numpy as jnp
from jax.experimental import pallas as pl
from jax.experimental.pallas import tpu as pltpu

NUM_BLOCKS = 3
BN_EPS = 1e-5
LANE = 128


def _round_up(n, m):
    return ((n + m - 1) // m) * m


def _bn_act(h, gamma, beta, *, relu):
    """Train-mode BatchNorm1d (batch stats, biased var), fused affine, opt. ReLU.

    One-pass stats -> one sublane-reduction sweep pair (XLU);
    y = h*scale + shift is 2 VPU ops/elem; rsqrt goes to the EUP slot.
    """
    mean = jnp.mean(h, axis=0, keepdims=True)
    var = jnp.maximum(jnp.mean(h * h, axis=0, keepdims=True) - mean * mean, 0.0)
    scale = gamma * jax.lax.rsqrt(var + BN_EPS)
    shift = beta - mean * scale
    y = h * scale + shift
    return jnp.maximum(y, 0.0) if relu else y


def residual_mlp_kernel(
    x_ref,      # (B, Dp)  f32   resident
    w0_ref,     # (Dp, Hp) bf16  resident          (input_proj weight, no bias)
    bn0_ref,    # (2, Hp)  f32   resident          [gamma0; beta0]
    wa_ref,     # (Hp, Hp) bf16  streamed block i  (first Linear of block)
    wb_ref,     # (Hp, Hp) bf16  streamed block i  (second Linear of block)
    bnb_ref,    # (4, Hp)  f32   streamed block i  [ga; bea; gb; beb]
    wo_ref,     # (Hp, Op) bf16  resident          (output_proj weight)
    bo_ref,     # (1, Op)  f32   resident          (output_proj bias)
    o_ref,      # (B, Op)  f32   resident output
    h_ref,      # (B, Hp)  f32   VMEM scratch: activation carried across blocks
):
    i = pl.program_id(0)

    # ---- input_proj: Linear -> BN -> ReLU (pre-BN bias dropped: cancelled) ----
    @pl.when(i == 0)
    def _input_proj():
        h0 = jnp.dot(x_ref[...].astype(jnp.bfloat16), w0_ref[...],
                     preferred_element_type=jnp.float32)
        h_ref[...] = _bn_act(h0, bn0_ref[0:1, :], bn0_ref[1:2, :], relu=True)

    # ---- residual block i: Linear->BN->ReLU->Linear->BN, +residual, ReLU ----
    h = h_ref[...]
    t = jnp.dot(h.astype(jnp.bfloat16), wa_ref[...],
                preferred_element_type=jnp.float32)
    t = _bn_act(t, bnb_ref[0:1, :], bnb_ref[1:2, :], relu=True)
    t = jnp.dot(t.astype(jnp.bfloat16), wb_ref[...],
                preferred_element_type=jnp.float32)
    t = _bn_act(t, bnb_ref[2:3, :], bnb_ref[3:4, :], relu=False)
    h_new = jnp.maximum(t + h, 0.0)
    h_ref[...] = h_new

    # ---- output_proj (lane-dense padded output slab) ----
    @pl.when(i == pl.num_programs(0) - 1)
    def _output_proj():
        out = jnp.dot(h_new.astype(jnp.bfloat16), wo_ref[...],
                      preferred_element_type=jnp.float32) + bo_ref[...]
        o_ref[...] = out.astype(o_ref.dtype)


def pack_params(p, input_dim, hidden_dim, output_dim):
    """Pad dims to lane multiples, cast weights to bf16, pack BN vectors,
    drop pre-BN biases. Padded lanes get zero weight/gamma/beta => stay 0."""
    Dp = _round_up(input_dim, LANE)
    Hp = _round_up(hidden_dim, LANE)
    Op = _round_up(output_dim, LANE)

    def pad2(a, r, c):
        return jnp.pad(a, ((0, r - a.shape[0]), (0, c - a.shape[1])))

    kp = {
        "w0": pad2(p["w0"], Dp, Hp).astype(jnp.bfloat16),
        "bn0": jnp.concatenate(
            [pad2(p["g0"], 1, Hp), pad2(p["be0"], 1, Hp)], axis=0),            # (2,Hp) f32
        "wa": jnp.stack([pad2(p["wa"][i], Hp, Hp)
                         for i in range(NUM_BLOCKS)]).astype(jnp.bfloat16),
        "wb": jnp.stack([pad2(p["wb"][i], Hp, Hp)
                         for i in range(NUM_BLOCKS)]).astype(jnp.bfloat16),
        "bnb": jnp.stack([
            jnp.concatenate([pad2(p["ga"][i], 1, Hp), pad2(p["bea"][i], 1, Hp),
                             pad2(p["gb"][i], 1, Hp), pad2(p["beb"][i], 1, Hp)],
                            axis=0)
            for i in range(NUM_BLOCKS)]),                                       # (NB,4,Hp) f32
        "wo": pad2(p["wo"], Hp, Op).astype(jnp.bfloat16),
        "bo": pad2(p["bo"], 1, Op),                                             # (1,Op) f32
        "dims": (Dp, Hp, Op),
        "out_dim": output_dim,
    }
    return kp


def residual_mlp(x, kp):
    Dp, Hp, Op = kp["dims"]
    B, Din = x.shape
    x_p = jnp.pad(x, ((0, 0), (0, Dp - Din))).astype(jnp.float32)

    flops = 2 * B * (Dp * Hp + NUM_BLOCKS * 2 * Hp * Hp + Hp * Op)
    transcendentals = (1 + 2 * NUM_BLOCKS) * Hp
    bytes_accessed = (
        x_p.size * 4 + B * Op * 4
        + kp["w0"].size * 2 + kp["wa"].size * 2 + kp["wb"].size * 2
        + kp["wo"].size * 2
        + kp["bn0"].size * 4 + kp["bnb"].size * 4 + kp["bo"].size * 4
    )

    out = pl.pallas_call(
        residual_mlp_kernel,
        out_shape=jax.ShapeDtypeStruct((B, Op), jnp.float32),
        grid_spec=pltpu.PrefetchScalarGridSpec(
            num_scalar_prefetch=0,
            grid=(NUM_BLOCKS,),
            in_specs=[
                pl.BlockSpec((B, Dp), lambda i: (0, 0)),            # x   (resident)
                pl.BlockSpec((Dp, Hp), lambda i: (0, 0)),           # w0  (resident)
                pl.BlockSpec((2, Hp), lambda i: (0, 0)),            # bn0 (resident)
                pl.BlockSpec((None, Hp, Hp), lambda i: (i, 0, 0)),  # wa[i]  (streamed)
                pl.BlockSpec((None, Hp, Hp), lambda i: (i, 0, 0)),  # wb[i]  (streamed)
                pl.BlockSpec((None, 4, Hp), lambda i: (i, 0, 0)),   # bnb[i] (streamed)
                pl.BlockSpec((Hp, Op), lambda i: (0, 0)),           # wo  (resident)
                pl.BlockSpec((1, Op), lambda i: (0, 0)),            # bo  (resident)
            ],
            out_specs=pl.BlockSpec((B, Op), lambda i: (0, 0)),
            scratch_shapes=[pltpu.VMEM((B, Hp), jnp.float32)],
        ),
        compiler_params=pltpu.CompilerParams(
            dimension_semantics=("arbitrary",)),
        cost_estimate=pl.CostEstimate(
            flops=flops, transcendentals=transcendentals,
            bytes_accessed=bytes_accessed),
    )(x_p, kp["w0"], kp["bn0"], kp["wa"], kp["wb"], kp["bnb"], kp["wo"], kp["bo"])
    return out[:, :kp["out_dim"]]


def init_params(key, input_dim, hidden_dim, output_dim, num_blocks=NUM_BLOCKS):
    """Deterministic synthetic params (PyTorch-layout semantics; Linear weights
    stored (in, out)). Biases are kept here for the reference; pre-BN biases
    are dropped by pack_params since BN cancels them exactly."""
    ks = jax.random.split(key, 16)

    def lin(k, din, dout, scale):
        kw, kb = jax.random.split(k)
        w = jax.random.normal(kw, (din, dout), jnp.float32) * scale
        b = jax.random.normal(kb, (1, dout), jnp.float32) * 0.02
        return w, b

    def bn(k, d):
        kg, kb = jax.random.split(k)
        g = 1.0 + 0.1 * jax.random.normal(kg, (1, d), jnp.float32)
        be = 0.05 * jax.random.normal(kb, (1, d), jnp.float32)
        return g, be

    p = {}
    p["w0"], p["b0"] = lin(ks[0], input_dim, hidden_dim, 1.0 / jnp.sqrt(input_dim))
    p["g0"], p["be0"] = bn(ks[1], hidden_dim)

    wa, ba, ga, bea, wb, bb, gb, beb = [], [], [], [], [], [], [], []
    for i in range(num_blocks):
        k0, k1, k2, k3 = jax.random.split(ks[2 + i], 4)
        w, b = lin(k0, hidden_dim, hidden_dim, 1.0 / jnp.sqrt(hidden_dim))
        g, be = bn(k1, hidden_dim)
        wa.append(w); ba.append(b); ga.append(g); bea.append(be)
        w, b = lin(k2, hidden_dim, hidden_dim, 1.0 / jnp.sqrt(hidden_dim))
        g, be = bn(k3, hidden_dim)
        wb.append(w); bb.append(b); gb.append(g); beb.append(be)
    p["wa"] = jnp.stack(wa); p["ba"] = jnp.stack(ba)
    p["ga"] = jnp.stack(ga); p["bea"] = jnp.stack(bea)
    p["wb"] = jnp.stack(wb); p["bb"] = jnp.stack(bb)
    p["gb"] = jnp.stack(gb); p["beb"] = jnp.stack(beb)

    p["wo"], p["bo"] = lin(ks[10], hidden_dim, output_dim, 1.0 / jnp.sqrt(hidden_dim))
    return p


def residual_mlp_ref(x, p):
    """Pure-JAX reference mirroring the PyTorch forward (train-mode BN, biases
    included, two-pass variance). Matmul operands cast to bf16 with f32
    accumulation to mirror the kernel's MXU precision."""
    def mm(a, w):
        return jnp.dot(a.astype(jnp.bfloat16), w.astype(jnp.bfloat16),
                       preferred_element_type=jnp.float32)

    def bnr(h, g, be):
        m = jnp.mean(h, axis=0, keepdims=True)
        v = jnp.mean((h - m) ** 2, axis=0, keepdims=True)
        return (h - m) / jnp.sqrt(v + BN_EPS) * g + be

    h = jnp.maximum(bnr(mm(x, p["w0"]) + p["b0"], p["g0"], p["be0"]), 0.0)
    for i in range(NUM_BLOCKS):
        r = h
        t = jnp.maximum(bnr(mm(h, p["wa"][i]) + p["ba"][i], p["ga"][i], p["bea"][i]), 0.0)
        t = bnr(mm(t, p["wb"][i]) + p["bb"][i], p["gb"][i], p["beb"][i])
        h = jnp.maximum(t + r, 0.0)
    return mm(h, p["wo"]) + p["bo"]


if __name__ == "__main__":
    batch, input_dim, hidden_dim, output_dim = 8, 16, 32, 8

    key = jax.random.PRNGKey(0)
    kx, kp_key = jax.random.split(key)
    x = jax.random.normal(kx, (batch, input_dim), jnp.float32)
    params = init_params(kp_key, input_dim, hidden_dim, output_dim)
    kparams = pack_params(params, input_dim, hidden_dim, output_dim)

    out = residual_mlp(x, kparams)
    out = jax.block_until_ready(out)

    ref = residual_mlp_ref(x, params)
    assert out.shape == (batch, output_dim)
    # bf16 matmul operands + rare bf16-rounding boundary divergences between
    # kernel and reference (bias-drop / one-pass var are f32-level) => 1e-2 tol.
    assert jnp.allclose(out, ref, atol=1e-2, rtol=1e-2), "mismatch vs pure-JAX reference"

    print("KERNEL_OK")
</pallas_src>

<mosaic_0001>
module attributes {stable_mosaic.version = 11 : i64} {
  func.func @residual_mlp_kernel(%arg0: i32, %arg1: memref<8x128xf32, #tpu.memory_space<vmem>>, %arg2: memref<128x128xbf16, #tpu.memory_space<vmem>>, %arg3: memref<2x128xf32, #tpu.memory_space<vmem>>, %arg4: memref<1x128x128xbf16, #tpu.memory_space<vmem>>, %arg5: memref<1x128x128xbf16, #tpu.memory_space<vmem>>, %arg6: memref<1x4x128xf32, #tpu.memory_space<vmem>>, %arg7: memref<128x128xbf16, #tpu.memory_space<vmem>>, %arg8: memref<1x128xf32, #tpu.memory_space<vmem>>, %arg9: memref<8x128xf32, #tpu.memory_space<vmem>>, %arg10: memref<8x128xf32, #tpu.memory_space<vmem>>) attributes {dimension_semantics = [#tpu.dimension_semantics<arbitrary>], iteration_bounds = array<i64: 3>, scalar_prefetch = 0 : i64, scratch_operands = 1 : i64, tpu.core_type = #tpu.core_type<tc>, window_params = [{pipeline_mode = #tpu.pipeline_mode<synchronous>, transform_indices = @transform_0, window_bounds = array<i64: 8, 128>}, {pipeline_mode = #tpu.pipeline_mode<synchronous>, transform_indices = @transform_1, window_bounds = array<i64: 128, 128>}, {pipeline_mode = #tpu.pipeline_mode<synchronous>, transform_indices = @transform_2, window_bounds = array<i64: 2, 128>}, {transform_indices = @transform_3, window_bounds = array<i64: 1, 128, 128>}, {transform_indices = @transform_4, window_bounds = array<i64: 1, 128, 128>}, {transform_indices = @transform_5, window_bounds = array<i64: 1, 4, 128>}, {pipeline_mode = #tpu.pipeline_mode<synchronous>, transform_indices = @transform_6, window_bounds = array<i64: 128, 128>}, {pipeline_mode = #tpu.pipeline_mode<synchronous>, transform_indices = @transform_7, window_bounds = array<i64: 1, 128>}, {pipeline_mode = #tpu.pipeline_mode<synchronous>, transform_indices = @transform_8, window_bounds = array<i64: 8, 128>}]} {
    %c0_i32 = arith.constant 0 : i32
    %0 = arith.cmpi eq, %arg0, %c0_i32 : i32
    %1 = arith.extui %0 : i1 to i32
    %c0_i32_0 = arith.constant 0 : i32
    %2 = arith.cmpi ne, %1, %c0_i32_0 : i32
    scf.if %2 {
      %c0_35 = arith.constant 0 : index
      %c0_36 = arith.constant 0 : index
      %75 = vector.load %arg1[%c0_35, %c0_36] : memref<8x128xf32, #tpu.memory_space<vmem>>, vector<8x128xf32>
      %76 = arith.truncf %75 : vector<8x128xf32> to vector<8x128xbf16>
      %c0_37 = arith.constant 0 : index
      %c0_38 = arith.constant 0 : index
      %77 = vector.load %arg2[%c0_37, %c0_38] : memref<128x128xbf16, #tpu.memory_space<vmem>>, vector<128x128xbf16>
      %cst_39 = arith.constant dense<0.000000e+00> : vector<8x128xf32>
      %78 = tpu.matmul %76, %77, %cst_39 {dimension_numbers = #tpu.dot_dimension_numbers<[1], [0], [0], [1], [0, 0, 1, 1], [], []>} : vector<8x128xbf16>, vector<128x128xbf16>, vector<8x128xf32> -> vector<8x128xf32>
      %c0_40 = arith.constant 0 : index
      %c0_41 = arith.constant 0 : index
      %79 = vector.load %arg3[%c0_40, %c0_41] : memref<2x128xf32, #tpu.memory_space<vmem>>, vector<1x128xf32>
      %c1_42 = arith.constant 1 : index
      %c0_43 = arith.constant 0 : index
      %80 = vector.load %arg3[%c1_42, %c0_43] : memref<2x128xf32, #tpu.memory_space<vmem>>, vector<1x128xf32>
      %cst_44 = arith.constant dense<0.000000e+00> : vector<128xf32>
      %81 = vector.multi_reduction <add>, %78, %cst_44 [0] : vector<8x128xf32> to vector<128xf32>
      %82 = vector.shape_cast %81 : vector<128xf32> to vector<1x128xf32>
      %cst_45 = arith.constant 8.000000e+00 : f32
      %83 = vector.broadcast %cst_45 : f32 to vector<1x128xf32>
      %84 = arith.divf %82, %83 : vector<1x128xf32>
      %85 = arith.mulf %78, %78 : vector<8x128xf32>
      %cst_46 = arith.constant dense<0.000000e+00> : vector<128xf32>
      %86 = vector.multi_reduction <add>, %85, %cst_46 [0] : vector<8x128xf32> to vector<128xf32>
      %87 = vector.shape_cast %86 : vector<128xf32> to vector<1x128xf32>
      %cst_47 = arith.constant 8.000000e+00 : f32
      %88 = vector.broadcast %cst_47 : f32 to vector<1x128xf32>
      %89 = arith.divf %87, %88 : vector<1x128xf32>
      %90 = arith.mulf %84, %84 : vector<1x128xf32>
      %91 = arith.subf %89, %90 : vector<1x128xf32>
      %cst_48 = arith.constant 0.000000e+00 : f32
      %92 = vector.broadcast %cst_48 : f32 to vector<1x128xf32>
      %93 = arith.maximumf %91, %92 : vector<1x128xf32>
      %cst_49 = arith.constant 9.99999974E-6 : f32
      %94 = vector.broadcast %cst_49 : f32 to vector<1x128xf32>
      %95 = arith.addf %93, %94 : vector<1x128xf32>
      %96 = math.rsqrt %95 : vector<1x128xf32>
      %97 = arith.mulf %79, %96 : vector<1x128xf32>
      %98 = arith.mulf %84, %97 : vector<1x128xf32>
      %99 = arith.subf %80, %98 : vector<1x128xf32>
      %100 = vector.broadcast %97 : vector<1x128xf32> to vector<8x128xf32>
      %101 = arith.mulf %78, %100 : vector<8x128xf32>
      %102 = vector.broadcast %99 : vector<1x128xf32> to vector<8x128xf32>
      %103 = arith.addf %101, %102 : vector<8x128xf32>
      %cst_50 = arith.constant 0.000000e+00 : f32
      %104 = vector.broadcast %cst_50 : f32 to vector<8x128xf32>
      %105 = arith.maximumf %103, %104 : vector<8x128xf32>
      %c0_51 = arith.constant 0 : index
      %c0_52 = arith.constant 0 : index
      %106 = vector.load %arg10[%c0_51, %c0_52] : memref<8x128xf32, #tpu.memory_space<vmem>>, vector<8x128xf32>
      tpu.vector_store %arg10[%c0_51, %c0_52], %105 {strides = array<i32>} : memref<8x128xf32, #tpu.memory_space<vmem>>, vector<8x128xf32>,
    } else {
    }
    %c0 = arith.constant 0 : index
    %c0_1 = arith.constant 0 : index
    %3 = vector.load %arg10[%c0, %c0_1] : memref<8x128xf32, #tpu.memory_space<vmem>>, vector<8x128xf32>
    %4 = arith.truncf %3 : vector<8x128xf32> to vector<8x128xbf16>
    %c0_2 = arith.constant 0 : index
    %c0_3 = arith.constant 0 : index
    %c0_4 = arith.constant 0 : index
    %5 = vector.load %arg4[%c0_2, %c0_3, %c0_4] : memref<1x128x128xbf16, #tpu.memory_space<vmem>>, vector<1x128x128xbf16>
    %6 = vector.shape_cast %5 : vector<1x128x128xbf16> to vector<128x128xbf16>
    %cst = arith.constant dense<0.000000e+00> : vector<8x128xf32>
    %7 = tpu.matmul %4, %6, %cst {dimension_numbers = #tpu.dot_dimension_numbers<[1], [0], [0], [1], [0, 0, 1, 1], [], []>} : vector<8x128xbf16>, vector<128x128xbf16>, vector<8x128xf32> -> vector<8x128xf32>
    %c0_5 = arith.constant 0 : index
    %c0_6 = arith.constant 0 : index
    %c0_7 = arith.constant 0 : index
    %8 = vector.load %arg6[%c0_5, %c0_6, %c0_7] : memref<1x4x128xf32, #tpu.memory_space<vmem>>, vector<1x1x128xf32>
    %9 = vector.shape_cast %8 : vector<1x1x128xf32> to vector<1x128xf32>
    %c0_8 = arith.constant 0 : index
    %c1 = arith.constant 1 : index
    %c0_9 = arith.constant 0 : index
    %10 = vector.load %arg6[%c0_8, %c1, %c0_9] : memref<1x4x128xf32, #tpu.memory_space<vmem>>, vector<1x1x128xf32>
    %11 = vector.shape_cast %10 : vector<1x1x128xf32> to vector<1x128xf32>
    %cst_10 = arith.constant dense<0.000000e+00> : vector<128xf32>
    %12 = vector.multi_reduction <add>, %7, %cst_10 [0] : vector<8x128xf32> to vector<128xf32>
    %13 = vector.shape_cast %12 : vector<128xf32> to vector<1x128xf32>
    %cst_11 = arith.constant 8.000000e+00 : f32
    %14 = vector.broadcast %cst_11 : f32 to vector<1x128xf32>
    %15 = arith.divf %13, %14 : vector<1x128xf32>
    %16 = arith.mulf %7, %7 : vector<8x128xf32>
    %cst_12 = arith.constant dense<0.000000e+00> : vector<128xf32>
    %17 = vector.multi_reduction <add>, %16, %cst_12 [0] : vector<8x128xf32> to vector<128xf32>
    %18 = vector.shape_cast %17 : vector<128xf32> to vector<1x128xf32>
    %cst_13 = arith.constant 8.000000e+00 : f32
    %19 = vector.broadcast %cst_13 : f32 to vector<1x128xf32>
    %20 = arith.divf %18, %19 : vector<1x128xf32>
    %21 = arith.mulf %15, %15 : vector<1x128xf32>
    %22 = arith.subf %20, %21 : vector<1x128xf32>
    %cst_14 = arith.constant 0.000000e+00 : f32
    %23 = vector.broadcast %cst_14 : f32 to vector<1x128xf32>
    %24 = arith.maximumf %22, %23 : vector<1x128xf32>
    %cst_15 = arith.constant 9.99999974E-6 : f32
    %25 = vector.broadcast %cst_15 : f32 to vector<1x128xf32>
    %26 = arith.addf %24, %25 : vector<1x128xf32>
    %27 = math.rsqrt %26 : vector<1x128xf32>
    %28 = arith.mulf %9, %27 : vector<1x128xf32>
    %29 = arith.mulf %15, %28 : vector<1x128xf32>
    %30 = arith.subf %11, %29 : vector<1x128xf32>
    %31 = vector.broadcast %28 : vector<1x128xf32> to vector<8x128xf32>
    %32 = arith.mulf %7, %31 : vector<8x128xf32>
    %33 = vector.broadcast %30 : vector<1x128xf32> to vector<8x128xf32>
    %34 = arith.addf %32, %33 : vector<8x128xf32>
    %cst_16 = arith.constant 0.000000e+00 : f32
    %35 = vector.broadcast %cst_16 : f32 to vector<8x128xf32>
    %36 = arith.maximumf %34, %35 : vector<8x128xf32>
    %37 = arith.truncf %36 : vector<8x128xf32> to vector<8x128xbf16>
    %c0_17 = arith.constant 0 : index
    %c0_18 = arith.constant 0 : index
    %c0_19 = arith.constant 0 : index
    %38 = vector.load %arg5[%c0_17, %c0_18, %c0_19] : memref<1x128x128xbf16, #tpu.memory_space<vmem>>, vector<1x128x128xbf16>
    %39 = vector.shape_cast %38 : vector<1x128x128xbf16> to vector<128x128xbf16>
    %cst_20 = arith.constant dense<0.000000e+00> : vector<8x128xf32>
    %40 = tpu.matmul %37, %39, %cst_20 {dimension_numbers = #tpu.dot_dimension_numbers<[1], [0], [0], [1], [0, 0, 1, 1], [], []>} : vector<8x128xbf16>, vector<128x128xbf16>, vector<8x128xf32> -> vector<8x128xf32>
    %c0_21 = arith.constant 0 : index
    %c2 = arith.constant 2 : index
    %c0_22 = arith.constant 0 : index
    %41 = vector.load %arg6[%c0_21, %c2, %c0_22] : memref<1x4x128xf32, #tpu.memory_space<vmem>>, vector<1x1x128xf32>
    %42 = vector.shape_cast %41 : vector<1x1x128xf32> to vector<1x128xf32>
    %c0_23 = arith.constant 0 : index
    %c3 = arith.constant 3 : index
    %c0_24 = arith.constant 0 : index
    %43 = vector.load %arg6[%c0_23, %c3, %c0_24] : memref<1x4x128xf32, #tpu.memory_space<vmem>>, vector<1x1x128xf32>
    %44 = vector.shape_cast %43 : vector<1x1x128xf32> to vector<1x128xf32>
    %cst_25 = arith.constant dense<0.000000e+00> : vector<128xf32>
    %45 = vector.multi_reduction <add>, %40, %cst_25 [0] : vector<8x128xf32> to vector<128xf32>
    %46 = vector.shape_cast %45 : vector<128xf32> to vector<1x128xf32>
    %cst_26 = arith.constant 8.000000e+00 : f32
    %47 = vector.broadcast %cst_26 : f32 to vector<1x128xf32>
    %48 = arith.divf %46, %47 : vector<1x128xf32>
    %49 = arith.mulf %40, %40 : vector<8x128xf32>
    %cst_27 = arith.constant dense<0.000000e+00> : vector<128xf32>
    %50 = vector.multi_reduction <add>, %49, %cst_27 [0] : vector<8x128xf32> to vector<128xf32>
    %51 = vector.shape_cast %50 : vector<128xf32> to vector<1x128xf32>
    %cst_28 = arith.constant 8.000000e+00 : f32
    %52 = vector.broadcast %cst_28 : f32 to vector<1x128xf32>
    %53 = arith.divf %51, %52 : vector<1x128xf32>
    %54 = arith.mulf %48, %48 : vector<1x128xf32>
    %55 = arith.subf %53, %54 : vector<1x128xf32>
    %cst_29 = arith.constant 0.000000e+00 : f32
    %56 = vector.broadcast %cst_29 : f32 to vector<1x128xf32>
    %57 = arith.maximumf %55, %56 : vector<1x128xf32>
    %cst_30 = arith.constant 9.99999974E-6 : f32
    %58 = vector.broadcast %cst_30 : f32 to vector<1x128xf32>
    %59 = arith.addf %57, %58 : vector<1x128xf32>
    %60 = math.rsqrt %59 : vector<1x128xf32>
    %61 = arith.mulf %42, %60 : vector<1x128xf32>
    %62 = arith.mulf %48, %61 : vector<1x128xf32>
    %63 = arith.subf %44, %62 : vector<1x128xf32>
    %64 = vector.broadcast %61 : vector<1x128xf32> to vector<8x128xf32>
    %65 = arith.mulf %40, %64 : vector<8x128xf32>
    %66 = vector.broadcast %63 : vector<1x128xf32> to vector<8x128xf32>
    %67 = arith.addf %65, %66 : vector<8x128xf32>
    %68 = arith.addf %67, %3 : vector<8x128xf32>
    %cst_31 = arith.constant 0.000000e+00 : f32
    %69 = vector.broadcast %cst_31 : f32 to vector<8x128xf32>
    %70 = arith.maximumf %68, %69 : vector<8x128xf32>
    %c0_32 = arith.constant 0 : index
    %c0_33 = arith.constant 0 : index
    %71 = vector.load %arg10[%c0_32, %c0_33] : memref<8x128xf32, #tpu.memory_space<vmem>>, vector<8x128xf32>
    tpu.vector_store %arg10[%c0_32, %c0_33], %70 {strides = array<i32>} : memref<8x128xf32, #tpu.memory_space<vmem>>, vector<8x128xf32>,
    %c2_i32 = arith.constant 2 : i32
    %72 = arith.cmpi eq, %arg0, %c2_i32 : i32
    %73 = arith.extui %72 : i1 to i32
    %c0_i32_34 = arith.constant 0 : i32
    %74 = arith.cmpi ne, %73, %c0_i32_34 : i32
    scf.if %74 {
      %75 = arith.truncf %70 : vector<8x128xf32> to vector<8x128xbf16>
      %c0_35 = arith.constant 0 : index
      %c0_36 = arith.constant 0 : index
      %76 = vector.load %arg7[%c0_35, %c0_36] : memref<128x128xbf16, #tpu.memory_space<vmem>>, vector<128x128xbf16>
      %cst_37 = arith.constant dense<0.000000e+00> : vector<8x128xf32>
      %77 = tpu.matmul %75, %76, %cst_37 {dimension_numbers = #tpu.dot_dimension_numbers<[1], [0], [0], [1], [0, 0, 1, 1], [], []>} : vector<8x128xbf16>, vector<128x128xbf16>, vector<8x128xf32> -> vector<8x128xf32>
      %c0_38 = arith.constant 0 : index
      %c0_39 = arith.constant 0 : index
      %78 = vector.load %arg8[%c0_38, %c0_39] : memref<1x128xf32, #tpu.memory_space<vmem>>, vector<1x128xf32>
      %79 = vector.broadcast %78 : vector<1x128xf32> to vector<8x128xf32>
      %80 = arith.addf %77, %79 : vector<8x128xf32>
      %c0_40 = arith.constant 0 : index
      %c0_41 = arith.constant 0 : index
      %81 = vector.load %arg9[%c0_40, %c0_41] : memref<8x128xf32, #tpu.memory_space<vmem>>, vector<8x128xf32>
      tpu.vector_store %arg9[%c0_40, %c0_41], %80 {strides = array<i32>} : memref<8x128xf32, #tpu.memory_space<vmem>>, vector<8x128xf32>,
    } else {
    }
    return
  }
  func.func @transform_0(%arg0: i32) -> (i32, i32) {
    %c0_i32 = arith.constant 0 : i32
    %c0_i32_0 = arith.constant 0 : i32
    %c0_i32_1 = arith.constant 0 : i32
    return %c0_i32, %c0_i32_0 : i32, i32
  }
  func.func @transform_1(%arg0: i32) -> (i32, i32) {
    %c0_i32 = arith.constant 0 : i32
    %c0_i32_0 = arith.constant 0 : i32
    %c0_i32_1 = arith.constant 0 : i32
    return %c0_i32, %c0_i32_0 : i32, i32
  }
  func.func @transform_2(%arg0: i32) -> (i32, i32) {
    %c0_i32 = arith.constant 0 : i32
    %c0_i32_0 = arith.constant 0 : i32
    %c0_i32_1 = arith.constant 0 : i32
    return %c0_i32, %c0_i32_0 : i32, i32
  }
  func.func @transform_3(%arg0: i32) -> (i32, i32, i32) {
    %c0_i32 = arith.constant 0 : i32
    %c0_i32_0 = arith.constant 0 : i32
    %c0_i32_1 = arith.constant 0 : i32
    return %arg0, %c0_i32, %c0_i32_0 : i32, i32, i32
  }
  func.func @transform_4(%arg0: i32) -> (i32, i32, i32) {
    %c0_i32 = arith.constant 0 : i32
    %c0_i32_0 = arith.constant 0 : i32
    %c0_i32_1 = arith.constant 0 : i32
    return %arg0, %c0_i32, %c0_i32_0 : i32, i32, i32
  }
  func.func @transform_5(%arg0: i32) -> (i32, i32, i32) {
    %c0_i32 = arith.constant 0 : i32
    %c0_i32_0 = arith.constant 0 : i32
    %c0_i32_1 = arith.constant 0 : i32
    return %arg0, %c0_i32, %c0_i32_0 : i32, i32, i32
  }
  func.func @transform_6(%arg0: i32) -> (i32, i32) {
    %c0_i32 = arith.constant 0 : i32
    %c0_i32_0 = arith.constant 0 : i32
    %c0_i32_1 = arith.constant 0 : i32
    return %c0_i32, %c0_i32_0 : i32, i32
  }
  func.func @transform_7(%arg0: i32) -> (i32, i32) {
    %c0_i32 = arith.constant 0 : i32
    %c0_i32_0 = arith.constant 0 : i32
    %c0_i32_1 = arith.constant 0 : i32
    return %c0_i32, %c0_i32_0 : i32, i32
  }
  func.func @transform_8(%arg0: i32) -> (i32, i32) {
    %c0_i32 = arith.constant 0 : i32
    %c0_i32_0 = arith.constant 0 : i32
    %c0_i32_1 = arith.constant 0 : i32
    return %c0_i32, %c0_i32_0 : i32, i32
  }
}

</mosaic_0001>

<bundles_post_ra>
// kernel: tpu_custom_call.1
= control target key start
LH: loop header
LB: loop body
LE: loop exit
PB: predicated region body
PF: predicated region fallthrough
CT: control target
= control target key end

     0   :  { %s1954_s0 = inlined_call_operand.hbm [shape: f32[8,128], index: 0, kind: input, shape index: {}]   ;;  %s1955_s1 = inlined_call_operand.hbm [shape: bf16[128,128], index: 1, kind: input, shape index: {}]   ;;  %s1956_s2 = inlined_call_operand.hbm [shape: f32[2,128], index: 2, kind: input, shape index: {}]   ;;  %s1957_s3 = inlined_call_operand.hbm [shape: bf16[3,128,128], index: 3, kind: input, shape index: {}]   ;;  %s1958_s4 = inlined_call_operand.hbm [shape: bf16[3,128,128], index: 4, kind: input, shape index: {}]   ;;  %s1959_s5 = inlined_call_operand.hbm [shape: f32[3,4,128], index: 5, kind: input, shape index: {}]   ;;  %s1960_s6 = inlined_call_operand.hbm [shape: bf16[128,128], index: 6, kind: input, shape index: {}]   ;;  %s1961_s7 = inlined_call_operand.vmem [shape: f32[1,128], index: 7, kind: input, shape index: {}]   ;;  %s1962_s8 = inlined_call_operand.hbm [shape: f32[8,128], index: 8, kind: output, shape index: {}]  }
   0x1   :  { %1969 = sst [smem:[#allocation24_spill]] %s1955_s1 }
   0x2   :  { %1970 = sst [smem:[#allocation25_spill]] %s1957_s3 }
   0x3   :  { %1971 = sst [smem:[#allocation26_spill]] %s1960_s6 }
   0x4   :  { %13 = vsyncpa [#allocation4], 0 }
   0x5   :  { %14 = vsyncpa [#allocation7], 0 }
   0x6   :  { %15 = vsyncpa [#allocation10], 0 }
   0x7   :  { %17 = vsyncpa [#allocation10 + $0x1], 0 }
   0x8   :  { %18 = vsyncpa [#allocation13], 0 }
   0x9   :  { %20 = vsyncpa [#allocation13 + $0x1], 0 }
   0xa   :  { %21 = vsyncpa [#allocation5], 0  ;;  %s1708_s27 = smov 0   ;;  %s1710_s28 = smov 0  }
   0xb   :  { %s1712_s29 = smov 0   ;;  %s1714_s30 = smov 0  }
   0xc LB: > { %s1727_s9 = sadd.s32 4294967295, %s1652_s30   ;;  %p110_p0 = scmp.ne.s32.totalorder %s1644_s28, %s1640_s27  ;;  %s1652_s30 = sphi %s1714_s30, %s1992_s30   ;;  %s1648_s29 = sphi %s1712_s29, %s1991_s29   ;;  %s1644_s28 = sphi %s1710_s28, %s1990_s28   ;;  %s1640_s27 = sphi %s1708_s27, %s1989_s27  }
   0xd   : > { %p111_p1 = scmp.eq.s32.totalorder %s1727_s9, 0  ;;  %p1058_p2 = scmp.ge.s32.totalorder %s1652_s30, 1 }
   0xe   : > { %p236_p3 = scmp.lt.s32.totalorder %s1652_s30, 4  ;;  %p1059_p4 = scmp.ne.s32.totalorder %s1727_s9, 0 }
   0xf   : > { %p1736_p5 = por %p111_p1, %p110_p0  ;;  %s1973_s1 = sld [smem:[#allocation24_spill]] }
  0x10   : > { %p1743_p6 = pnand %p1058_p2, %p236_p3  ;;  %s1654_s15 = smov [#allocation6]  }
  0x11   : > { %s261_s16 = sshll.u32 %s1654_s15, 4  ;;  %s1976_s6 = sld [smem:[#allocation26_spill]]  ;;  %s262_s16 = int_to_ptr.vmem [resolvable:$true] %s261_s16 }
  0x12   : > { %p1274_p7 = pneg %p1743_p6  ;;  %s1963_s21 = smov 64  }
  0x13   : > { %s1965_s22 = smov 4   ;;  %s1657_s23 = smov [#allocation14]  }
  0x14   : > { %p1751_p8 = pnand %p1274_p7, %p111_p1  ;;  %s287_s24 = sshll.u32 %s1657_s23, 4  ;;  %s288_s24 = int_to_ptr.vmem [resolvable:$true] %s287_s24 }
  0x15   : > { %s259_s13 = sshll.u32 %s1973_s1, 4  ;;  %s1769_s25 = sadd.s32 1, %s1652_s30   ;;  %s260_s13 = int_to_ptr.hbm [resolvable:$true] %s259_s13 }
  0x16   : > { %1280 = dma.hbm_to_vmem [thread:$0]  (!%p1751_p8), %s260_s13, 1024, %s262_s16, [#allocation7], %s1963_s21, %s1963_s21, %s1965_s22  }
  0x17   : > { %s285_s20 = sshll.u32 %s1976_s6, 4  ;;  %s97_s26 = sadd.s32 1, %s1648_s29  ;;  %s286_s20 = int_to_ptr.hbm [resolvable:$true] %s285_s20 }
  0x18   : > { %1286 = dma.hbm_to_vmem [thread:$0]  (!%p1751_p8), %s286_s20, 1024, %s288_s24, [#allocation13], %s1963_s21, %s1963_s21, %s1965_s22  }
  0x19   : > { %s94_s27 = ssub.s32 %s1652_s30, %s1769_s25  ;;  %p104_p9 = scmp.ne.s32.totalorder %s1648_s29, %s1644_s28 }
  0x1a   : > { %p95_p10 = scmp.eq.s32.totalorder %s94_s27, 0  ;;  %p105_p11 = scmp.eq.s32.totalorder %s1652_s30, 0 }
  0x1b   : > { %p1301_p12 = scmp.lt.s32.totalorder %s1652_s30, 3  ;;  %s1967_s13 = sand.u32 1, %s1648_s29  }
  0x1c   : > { %s1780_s12 = scalar_select %p95_p10, %s1648_s29, %s97_s26  }
  0x1d   : > { %p106_p13 = por %p105_p11, %p104_p9  ;;  %s1214_s15 = sshll.u32 %s1652_s30, 6 }
  0x1e   : > { %1977 = sst [smem:[#allocation22_spill]] %s1780_s12  ;;  %s1786_s16 = sshll.u32 %s1967_s13, 6 }
  0x1f   : > { %s1978_s3 = sld [smem:[#allocation25_spill]]  ;;  %s308_s24 = scalar_lea.vmem [#allocation9], %s1786_s16 }
  0x20   : > { %s316_s27 = sshll.u32 %s308_s24, 4  ;;  %p1794_p0 = pnand %p1301_p12, %p106_p13  ;;  %s317_s27 = int_to_ptr.vmem [resolvable:$true] %s316_s27 }
  0x21   : > { %s335_s13 = scalar_lea.hbm %s1958_s4, %s1214_s15  ;;  %s1980_s18 = sand.u32 1, %s1652_s30  }
  0x22   : > { %s336_s11 = sshll.u32 %s335_s13, 4  ;;  %s1803_s19 = scalar_lea.sflag [#allocation10], %s1980_s18  ;;  %s1822_s11 = int_to_ptr.hbm [resolvable:$true] %s336_s11 }
  0x23   : > { %p1424_p3 = pneg %p1794_p0 }
  0x25   : > { %s313_s20 = scalar_lea.hbm %s1978_s3, %s1214_s15  ;;  %s1427_s21 = scalar_lea.hbm %s1978_s3, 192 }
  0x26   : > { %s314_s23 = sshll.u32 %s313_s20, 4  ;;  %s315_s23 = int_to_ptr.hbm [resolvable:$true] %s314_s23 }
  0x27   : > { %s1420_s20 = sshra.s32 %s315_s23, 4  ;;  %s1421_s20 = int_to_ptr.hbm [resolvable:$true] %s1420_s20 }
  0x28   : > { %s1422_s1 = scalar_lea.hbm %s1421_s20, 64  ;;  %p1428_p10 = scmp.lt.s32.totalorder %s1421_s20, %s1978_s3 }
  0x29   : > { %p1423_p2 = scmp.ne.s32.totalorder %s1421_s20, %s1422_s1  ;;  %p1429_p11 = scmp.lt.s32.totalorder %s1427_s21, %s1422_s1 }
  0x2b   : > { %p1425_p7 = pnand %p1424_p3, %p1423_p2  ;;  %p1430_p12 = por %p1429_p11, %p1428_p10 }
  0x2d   : > { %p1426_p9 = pneg %p1425_p7 }
  0x2f   : > { %p1431_p13 = pnand %p1430_p12, %p1426_p9 }
  0x31   : > { %1434 = shalt.err (!%p1431_p13)
}
  0x32   : > { %s1981_s13 = smov 4   ;;  %s1982_s18 = smov 64  }
  0x33   : > { %1290 = dma.hbm_to_vmem [thread:$0]  (!%p1794_p0), %s315_s23, 1024, %s317_s27, %s1803_s19, %s1982_s18, %s1982_s18, %s1981_s13  }
  0x34   : > { %s330_s6 = scalar_lea.vmem [#allocation11], %s1786_s16  ;;  %s248_s21 = sshll.u32 %s1954_s0, 4  ;;  %s249_s21 = int_to_ptr.hbm [resolvable:$true] %s248_s21 }
  0x35   : > { %s1825_s20 = sshll.u32 %s330_s6, 4  ;;  %s1658_s22 = smov [#allocation3]  }
  0x36   : > { %1983 = sst [smem:[#allocation23_spill]] %s1825_s20  ;;  %s250_s15 = sshll.u32 %s1658_s22, 4  ;;  %s251_s15 = int_to_ptr.vmem [resolvable:$true] %s250_s15 }
  0x37   : > { %s274_s23 = sshll.u32 %s1956_s2, 4  ;;  %s1659_s16 = smov [#allocation8]   ;;  %s275_s23 = int_to_ptr.hbm [resolvable:$true] %s274_s23 }
  0x38   : > { %1277 = dma.hbm_to_vmem [thread:$0]  (!%p1751_p8), %s249_s21, 128, %s251_s15, [#allocation4]  }
  0x39   : > { %s276_s27 = sshll.u32 %s1659_s16, 4  ;;  %s1984_s6 = sand.u32 1, %s1648_s29   ;;  %s277_s27 = int_to_ptr.vmem [resolvable:$true] %s276_s27 }
  0x3a   : > { %s1070_s20 = sshll.u32 %s1984_s6, 2  ;;  %s1510_s1 = sshra.s32 %s1822_s11, 4  ;;  %s1511_s1 = int_to_ptr.hbm [resolvable:$true] %s1510_s1 }
  0x3b   : > { %1283 = dma.hbm_to_vmem [thread:$0]  (!%p1751_p8), %s275_s23, 32, %s277_s27, [#allocation7]  }
  0x3c   : > { %s1512_s24 = scalar_lea.hbm %s1511_s1, 64  ;;  %s1517_s22 = scalar_lea.hbm %s1958_s4, 192 }
  0x3d   : > { %p1513_p2 = scmp.ne.s32.totalorder %s1511_s1, %s1512_s24  ;;  %p1518_p10 = scmp.lt.s32.totalorder %s1511_s1, %s1958_s4 }
  0x3e   : > { %p1519_p11 = scmp.lt.s32.totalorder %s1517_s22, %s1512_s24 }
  0x3f   : > { %p1515_p7 = pnand %p1513_p2, %p1424_p3 }
  0x40   : > { %p1520_p12 = por %p1519_p11, %p1518_p10 }
  0x41   : > { %p1516_p9 = pneg %p1515_p7 }
  0x43   : > { %p1521_p13 = pnand %p1520_p12, %p1516_p9 }
  0x45   : > { %1524 = shalt.err (!%p1521_p13)
}
  0x46   : > { %s1985_s17 = sld [smem:[#allocation23_spill]]  ;;  %s1071_s16 = sshll.u32 %s1652_s30, 2 }
  0x47   : > { %s352_s27 = scalar_lea.vmem [#allocation12], %s1070_s20  ;;  %s356_s3 = scalar_lea.hbm %s1959_s5, %s1071_s16 }
  0x48   : > { %s360_s6 = sshll.u32 %s352_s27, 4  ;;  %s358_s12 = sshll.u32 %s356_s3, 4  ;;  %s361_s6 = int_to_ptr.vmem [resolvable:$true] %s360_s6  ;;  %s359_s12 = int_to_ptr.hbm [resolvable:$true] %s358_s12 }
  0x49   : > { %s1987_s22 = sand.u32 1, %s1652_s30   ;;  %s1540_s15 = sshra.s32 %s359_s12, 4  ;;  %s1541_s15 = int_to_ptr.hbm [resolvable:$true] %s1540_s15 }
  0x4a   : > { %s349_s21 = scalar_lea.sflag [#allocation13], %s1987_s22  ;;  %p1548_p9 = scmp.lt.s32.totalorder %s1541_s15, %s1959_s5 }
  0x4c   : > { %s1986_s23 = int_to_ptr.vmem [resolvable:$true] %s1985_s17  ;;  %s1542_s17 = scalar_lea.hbm %s1541_s15, 4 }
  0x4d   : > { %1293 = dma.hbm_to_vmem [thread:$0]  (!%p1794_p0), %s1822_s11, 1024, %s1986_s23, %s1803_s19, %s1982_s18, %s1982_s18, %s1981_s13  }
  0x4e   : > { %p1543_p8 = scmp.ne.s32.totalorder %s1541_s15, %s1542_s17  ;;  %s1547_s13 = scalar_lea.hbm %s1959_s5, 12 }
  0x4f   : > { %p1549_p10 = scmp.lt.s32.totalorder %s1547_s13, %s1542_s17 }
  0x50   : > { %p1545_p2 = pnand %p1543_p8, %p1424_p3 }
  0x51   : > { %p1550_p11 = por %p1549_p10, %p1548_p9 }
  0x52   : > { %p1546_p7 = pneg %p1545_p2 }
  0x54   : > { %p1551_p12 = pnand %p1550_p11, %p1546_p7 }
  0x56   : > { %1554 = shalt.err (!%p1551_p12)
}
  0x57   : > { %1296 = dma.hbm_to_vmem [thread:$0]  (!%p1794_p0), %s359_s12, 64, %s361_s6, %s349_s21  }
  0x58   : > { %369 = sbr.rel (%p1743_p6) target bundleno = 885 (0x375), region = 52 }
  0x5d   : > { %1615 = dma.done.wait (%p111_p1), [#allocation4], 128  }
  0x5e   : > { %1617 = vsyncadd (%p111_p1), [#allocation4], 4294967168 }
  0x5f   : > { %1619 = dma.done.wait (%p111_p1), [#allocation7], 1056  }
  0x60   : > { %1621 = vsyncadd (%p111_p1), [#allocation7], 4294966240  ;;  %s386_s30 = sand.u32 1, %s1727_s9   ;;  %s388_s26 = sand.u32 1, %s1644_s28  }
  0x61   : > { %s1076_s23 = sshll.u32 %s388_s26, 6  ;;  %s387_s14 = scalar_lea.sflag [#allocation10], %s386_s30 }
  0x62   : > { %s1888_s16 = scalar_lea.vmem [#allocation9], %s1076_s23 }
  0x63   : > { %1623 = dma.done.wait (%p1736_p5), %s387_s14, 2048  }
  0x64   : > { %1625 = vsyncadd (%p1736_p5), %s387_s14, 4294965248  ;;  %s1078_s27 = sshll.u32 %s388_s26, 2  ;;  %s1894_s6 = scalar_lea.vmem [#allocation11], %s1076_s23 }
  0x65   : > { %s407_s1 = scalar_lea.sflag [#allocation13], %s386_s30  ;;  %s1896_s24 = scalar_lea.vmem [#allocation12], %s1078_s27 }
  0x66   : > { %1627 = dma.done.wait (%p1736_p5), %s407_s1, 64  }
  0x67   : > { %1629 = vsyncadd (%p1736_p5), %s407_s1, 4294967232 }
  0x68   : > { %1631 = dma.done.wait (%p111_p1), [#allocation13], 1024  }
  0x69   : > { %1633 = vsyncadd (%p111_p1), [#allocation13], 4294966272  ;;  %457 = sbr.rel (%p1059_p4) target bundleno = 321 (0x141), region = 84 }
  0x6e   : > { %v1223_v0 = vld [vmem:[#allocation6 + $0x38] sm:$0xff]  ;;  %v1222_v1 = vld [vmem:[#allocation6 + $0x30] sm:$0xff]  ;;  %v1221_v2 = vld [vmem:[#allocation6 + $0x28] sm:$0xff]  ;;  %v1660_v10 = vmov 8.0  }
  0x6f   : > { %524 = vmatpush.bf16.msra.mxu0 %v1223_v0  ;;  %v1220_v3 = vld [vmem:[#allocation6 + $0x20] sm:$0xff]  ;;  %v1219_v4 = vld [vmem:[#allocation6 + $0x18] sm:$0xff]  ;;  %v1218_v5 = vld [vmem:[#allocation6 + $0x10] sm:$0xff]  ;;  %1349 = vrcp.f32 %v1660_v10 }
  0x70   : > { %v1217_v6 = vld [vmem:[#allocation6 + $0x8] sm:$0xff]  ;;  %v1216_v7 = vld [vmem:[#allocation6] sm:$0xff]  ;;  %v458_v8 = vld [vmem:[#allocation3] sm:$0xff] }
  0x71   : > { %v459_v9 = vpack.c.bf16 %v458_v8, %v458_v8  ;;  %v537_v43 = vld [vmem:[#allocation8] sm:$0x1]  ;;  %v538_v47 = vld [vmem:[#allocation8 + $0x1] sm:$0x1] }
  0x73   : > { %525 = vmatpush.bf16.msra.mxu0 %v1222_v1 }
  0x75   : > { %v1350_v11 = vpop.eup %1349 }
  0x76   : > { %v546_v12 = vmul.f32 8.0, %v1350_v11  ;;  %vm550_vm0 = vweird.f32 %v1350_v11 }
  0x77   : > { %526 = vmatpush.bf16.msra.mxu0 %v1221_v2 }
  0x78   : > { %v547_v13 = vsub.f32 1.0, %v546_v12 }
  0x7a   : > { %v548_v17 = vmul.f32 %v1350_v11, %v547_v13 }
  0x7b   : > { %527 = vmatpush.bf16.msra.mxu0 %v1220_v3 }
  0x7c   : > { %v549_v22 = vadd.f32 %v1350_v11, %v548_v17 }
  0x7e   : > { %v551_v28 = vsel %vm550_vm0, %v1350_v11, %v549_v22 }
  0x7f   : > { %528 = vmatpush.bf16.msra.mxu0 %v1219_v4 }
  0x83   : > { %529 = vmatpush.bf16.msra.mxu0 %v1218_v5 }
  0x87   : > { %530 = vmatpush.bf16.msra.mxu0 %v1217_v6 }
  0x8b   : > { %531 = vmatpush.bf16.msra.mxu0 %v1216_v7 }
  0x8e   : > { %532 = vmatmul.bf16.vlgmr.msra.gmra.mxu0 %v459_v9 }
 0x10b   : > { %v533_v14 = vpop.f32.mrf.mxu0 }
 0x10c   : > { %v539_v15 = vrot.slane %v533_v14, 4  ;;  %v553_v16 = vmul.f32 %v533_v14, %v533_v14 }
 0x10e   : > { %v540_v18 = vadd.f32 %v539_v15, %v533_v14  ;;  %v554_v19 = vrot.slane %v553_v16, 4 }
 0x110   : > { %v541_v20 = vrot.slane %v540_v18, 2  ;;  %v555_v21 = vadd.f32 %v554_v19, %v553_v16 }
 0x112   : > { %v542_v23 = vadd.f32 %v541_v20, %v540_v18  ;;  %v556_v24 = vrot.slane %v555_v21, 2 }
 0x113   : > { %v535_v25 = vpop.f32.mrf.mxu0 }
 0x114   : > { %v543_v26 = vrot.slane %v542_v23, 1  ;;  %v557_v27 = vadd.f32 %v556_v24, %v555_v21 }
 0x116   : > { %v544_v29 = vadd.f32 %v543_v26, %v542_v23  ;;  %v558_v30 = vrot.slane %v557_v27, 1 }
 0x118   : > { %v552_v31 = vmul.f32 %v551_v28, %v544_v29  ;;  %v559_v32 = vadd.f32 %v558_v30, %v557_v27 }
 0x11a   : > { %v560_v33 = vmul.f32 %v559_v32, %v551_v28  ;;  %v561_v34 = vmul.f32 %v552_v31, %v552_v31 }
 0x11c   : > { %v562_v35 = vsub.f32 %v560_v33, %v561_v34 }
 0x11e   : > { %v563_v36 = vmax.f32 %v562_v35, 0.0 }
 0x120   : > { %v564_v37 = vadd.f32 1e-05, %v563_v36 }
 0x122   : > { %1351 = vrsqrt.f32 %v564_v37  ;;  %vm571_vm2 = vweird.f32 %v564_v37 }
 0x128   : > { %v1352_v38 = vpop.eup %1351 }
 0x129   : > { %v566_v39 = vmul.f32 %v1352_v38, %v564_v37  ;;  %vm572_vm1 = vweird.f32 %v1352_v38 }
 0x12a   : > { %vm573_vm3 = vmor %vm571_vm2, %vm572_vm1 }
 0x12b   : > { %v567_v40 = vmul.f32 %v1352_v38, %v566_v39 }
 0x12d   : > { %v568_v41 = vmul.f32 0.5, %v567_v40 }
 0x12f   : > { %v569_v42 = vsub.f32 1.5, %v568_v41 }
 0x131   : > { %v570_v44 = vmul.f32 %v1352_v38, %v569_v42 }
 0x133   : > { %v574_v45 = vsel %vm573_vm3, %v1352_v38, %v570_v44 }
 0x134   : > { %v575_v46 = vmul.f32 %v574_v45, %v537_v43 }
 0x136   : > { %v576_v48 = vmul.f32 %v575_v46, %v552_v31  ;;  %v578_v49 = vperm.slane %v575_v46, 0 }
 0x138   : > { %v577_v50 = vsub.f32 %v538_v47, %v576_v48  ;;  %v579_v51 = vmul.f32 %v578_v49, %v533_v14 }
 0x13a   : > { %v580_v52 = vperm.slane %v577_v50, 0 }
 0x13c   : > { %v581_v53 = vadd.f32 %v580_v52, %v579_v51 }
 0x13e   : > { %v582_v54 = vmax.f32 %v581_v53, 0.0 }
 0x140   : > { %583 = vst [vmem:[#allocation2] sm:$0xff] %v582_v54 }
 0x141 PF: > { %v1231_v55 = vld [vmem:[%s1888_s16 + $0x38] sm:$0xff]  ;;  %v1230_v56 = vld [vmem:[%s1888_s16 + $0x30] sm:$0xff]  ;;  %v1229_v57 = vld [vmem:[%s1888_s16 + $0x28] sm:$0xff]  ;;  %v1661_v3 = vmov 8.0   ;;  %p1177_p1 = scmp.ne.s32.totalorder %s1727_s9, 2 }
 0x142   : > { %650 = vmatpush.bf16.msra.mxu0 %v1231_v55  ;;  %v1228_v58 = vld [vmem:[%s1888_s16 + $0x20] sm:$0xff]  ;;  %v1227_v59 = vld [vmem:[%s1888_s16 + $0x18] sm:$0xff]  ;;  %v1226_v60 = vld [vmem:[%s1888_s16 + $0x10] sm:$0xff]  ;;  %1353 = vrcp.f32 %v1661_v3 }
 0x143   : > { %v1225_v61 = vld [vmem:[%s1888_s16 + $0x8] sm:$0xff]  ;;  %v1224_v62 = vld [vmem:[%s1888_s16] sm:$0xff]  ;;  %v1239_v1 = vld [vmem:[%s1894_s6 + $0x38] sm:$0xff] }
 0x144   : > { %774 = vmatpush.bf16.msra.mxu1 %v1239_v1  ;;  %v1238_v2 = vld [vmem:[%s1894_s6 + $0x30] sm:$0xff]  ;;  %v1237_v4 = vld [vmem:[%s1894_s6 + $0x28] sm:$0xff]  ;;  %v1236_v6 = vld [vmem:[%s1894_s6 + $0x20] sm:$0xff] }
 0x145   : > { %v1235_v8 = vld [vmem:[%s1894_s6 + $0x18] sm:$0xff]  ;;  %v1234_v10 = vld [vmem:[%s1894_s6 + $0x10] sm:$0xff]  ;;  %v1233_v17 = vld [vmem:[%s1894_s6 + $0x8] sm:$0xff] }
 0x146   : > { %651 = vmatpush.bf16.msra.mxu0 %v1230_v56  ;;  %v1232_v23 = vld [vmem:[%s1894_s6] sm:$0xff] }
 0x147   : > { %v1916_v63 = vld [vmem:[#allocation2] sm:$0xff]  ;;  %v663_v42 = vld [vmem:[%s1896_s24] sm:$0x1]  ;;  %v664_v46 = vld [vmem:[%s1896_s24 + $0x1] sm:$0x1] }
 0x148   : > { %v585_v0 = vpack.c.bf16 %v1916_v63, %v1916_v63  ;;  %775 = vmatpush.bf16.msra.mxu1 %v1238_v2  ;;  %v1354_v5 = vpop.eup %1353 }
 0x149   : > { %v672_v7 = vmul.f32 8.0, %v1354_v5  ;;  %vm676_vm4 = vweird.f32 %v1354_v5 }
 0x14a   : > { %652 = vmatpush.bf16.msra.mxu0 %v1229_v57 }
 0x14b   : > { %v673_v9 = vsub.f32 1.0, %v672_v7 }
 0x14c   : > { %776 = vmatpush.bf16.msra.mxu1 %v1237_v4 }
 0x14d   : > { %v674_v14 = vmul.f32 %v1354_v5, %v673_v9 }
 0x14e   : > { %653 = vmatpush.bf16.msra.mxu0 %v1228_v58 }
 0x14f   : > { %v675_v20 = vadd.f32 %v1354_v5, %v674_v14 }
 0x150   : > { %777 = vmatpush.bf16.msra.mxu1 %v1236_v6 }
 0x151   : > { %v677_v27 = vsel %vm676_vm4, %v1354_v5, %v675_v20 }
 0x152   : > { %654 = vmatpush.bf16.msra.mxu0 %v1227_v59 }
 0x154   : > { %778 = vmatpush.bf16.msra.mxu1 %v1235_v8 }
 0x156   : > { %655 = vmatpush.bf16.msra.mxu0 %v1226_v60 }
 0x158   : > { %779 = vmatpush.bf16.msra.mxu1 %v1234_v10 }
 0x15a   : > { %656 = vmatpush.bf16.msra.mxu0 %v1225_v61 }
 0x15c   : > { %780 = vmatpush.bf16.msra.mxu1 %v1233_v17 }
 0x15e   : > { %657 = vmatpush.bf16.msra.mxu0 %v1224_v62 }
 0x160   : > { %781 = vmatpush.bf16.msra.mxu1 %v1232_v23 }
 0x161   : > { %658 = vmatmul.bf16.vlgmr.msra.gmra.mxu0 %v585_v0 }
 0x1de   : > { %v659_v11 = vpop.f32.mrf.mxu0 }
 0x1df   : > { %v665_v12 = vrot.slane %v659_v11, 4  ;;  %v679_v13 = vmul.f32 %v659_v11, %v659_v11 }
 0x1e1   : > { %v666_v15 = vadd.f32 %v665_v12, %v659_v11  ;;  %v680_v16 = vrot.slane %v679_v13, 4 }
 0x1e3   : > { %v667_v18 = vrot.slane %v666_v15, 2  ;;  %v681_v19 = vadd.f32 %v680_v16, %v679_v13 }
 0x1e5   : > { %v668_v21 = vadd.f32 %v667_v18, %v666_v15  ;;  %v682_v22 = vrot.slane %v681_v19, 2  ;;  %v787_v18 = vld [vmem:[%s1896_s24 + $0x2] sm:$0x1] }
 0x1e6   : > { %v661_v24 = vpop.f32.mrf.mxu0 }
 0x1e7   : > { %v669_v25 = vrot.slane %v668_v21, 1  ;;  %v683_v26 = vadd.f32 %v682_v22, %v681_v19  ;;  %v788_v22 = vld [vmem:[%s1896_s24 + $0x3] sm:$0x1] }
 0x1e9   : > { %v670_v28 = vadd.f32 %v669_v25, %v668_v21  ;;  %v684_v29 = vrot.slane %v683_v26, 1 }
 0x1eb   : > { %v685_v30 = vadd.f32 %v684_v29, %v683_v26  ;;  %v678_v31 = vmul.f32 %v677_v27, %v670_v28 }
 0x1ed   : > { %v686_v32 = vmul.f32 %v685_v30, %v677_v27  ;;  %v687_v33 = vmul.f32 %v678_v31, %v678_v31 }
 0x1ef   : > { %v688_v34 = vsub.f32 %v686_v32, %v687_v33 }
 0x1f1   : > { %v689_v35 = vmax.f32 %v688_v34, 0.0 }
 0x1f3   : > { %v690_v36 = vadd.f32 1e-05, %v689_v35 }
 0x1f5   : > { %1355 = vrsqrt.f32 %v690_v36  ;;  %vm697_vm6 = vweird.f32 %v690_v36 }
 0x1fb   : > { %v1356_v37 = vpop.eup %1355 }
 0x1fc   : > { %v692_v38 = vmul.f32 %v1356_v37, %v690_v36  ;;  %vm698_vm5 = vweird.f32 %v1356_v37 }
 0x1fd   : > { %vm699_vm7 = vmor %vm697_vm6, %vm698_vm5 }
 0x1fe   : > { %v693_v39 = vmul.f32 %v1356_v37, %v692_v38 }
 0x200   : > { %v694_v40 = vmul.f32 0.5, %v693_v39 }
 0x202   : > { %v695_v41 = vsub.f32 1.5, %v694_v40 }
 0x204   : > { %v696_v43 = vmul.f32 %v1356_v37, %v695_v41 }
 0x206   : > { %v700_v44 = vsel %vm699_vm7, %v1356_v37, %v696_v43 }
 0x207   : > { %v701_v45 = vmul.f32 %v700_v44, %v663_v42 }
 0x209   : > { %v702_v47 = vmul.f32 %v701_v45, %v678_v31  ;;  %v704_v48 = vperm.slane %v701_v45, 0 }
 0x20b   : > { %v703_v49 = vsub.f32 %v664_v46, %v702_v47  ;;  %v705_v50 = vmul.f32 %v704_v48, %v659_v11 }
 0x20d   : > { %v706_v51 = vperm.slane %v703_v49, 0 }
 0x20f   : > { %v707_v52 = vadd.f32 %v706_v51, %v705_v50 }
 0x211   : > { %v708_v53 = vmax.f32 %v707_v52, 0.0 }
 0x213   : > { %v709_v54 = vpack.c.bf16 %v708_v53, %v708_v53 }
 0x215   : > { %782 = vmatmul.bf16.vlgmr.msra.gmra.mxu1 %v709_v54 }
 0x292   : > { %v783_v55 = vpop.f32.mrf.mxu1 }
 0x293   : > { %v789_v56 = vrot.slane %v783_v55, 4  ;;  %v796_v57 = vmul.f32 %v783_v55, %v783_v55 }
 0x295   : > { %v790_v58 = vadd.f32 %v789_v56, %v783_v55  ;;  %v797_v59 = vrot.slane %v796_v57, 4 }
 0x297   : > { %v791_v60 = vrot.slane %v790_v58, 2  ;;  %v798_v61 = vadd.f32 %v797_v59, %v796_v57 }
 0x299   : > { %v792_v62 = vadd.f32 %v791_v60, %v790_v58  ;;  %v799_v0 = vrot.slane %v798_v61, 2 }
 0x29a   : > { %v785_v1 = vpop.f32.mrf.mxu1 }
 0x29b   : > { %v793_v2 = vrot.slane %v792_v62, 1  ;;  %v800_v3 = vadd.f32 %v799_v0, %v798_v61 }
 0x29d   : > { %v794_v4 = vadd.f32 %v793_v2, %v792_v62  ;;  %v801_v5 = vrot.slane %v800_v3, 1 }
 0x29f   : > { %v795_v6 = vmul.f32 %v794_v4, %v677_v27  ;;  %v802_v7 = vadd.f32 %v801_v5, %v800_v3 }
 0x2a1   : > { %v803_v8 = vmul.f32 %v802_v7, %v677_v27  ;;  %v804_v9 = vmul.f32 %v795_v6, %v795_v6 }
 0x2a3   : > { %v805_v10 = vsub.f32 %v803_v8, %v804_v9 }
 0x2a5   : > { %v806_v11 = vmax.f32 %v805_v10, 0.0 }
 0x2a7   : > { %v807_v12 = vadd.f32 1e-05, %v806_v11 }
 0x2a9   : > { %1357 = vrsqrt.f32 %v807_v12  ;;  %vm814_vm9 = vweird.f32 %v807_v12 }
 0x2af   : > { %v1358_v13 = vpop.eup %1357 }
 0x2b0   : > { %v809_v14 = vmul.f32 %v1358_v13, %v807_v12  ;;  %vm815_vm8 = vweird.f32 %v1358_v13 }
 0x2b1   : > { %vm816_vm10 = vmor %vm814_vm9, %vm815_vm8 }
 0x2b2   : > { %v810_v15 = vmul.f32 %v1358_v13, %v809_v14 }
 0x2b4   : > { %v811_v16 = vmul.f32 0.5, %v810_v15 }
 0x2b6   : > { %v812_v17 = vsub.f32 1.5, %v811_v16 }
 0x2b8   : > { %v813_v19 = vmul.f32 %v1358_v13, %v812_v17 }
 0x2ba   : > { %v817_v20 = vsel %vm816_vm10, %v1358_v13, %v813_v19 }
 0x2bb   : > { %v818_v21 = vmul.f32 %v817_v20, %v787_v18 }
 0x2bd   : > { %v819_v23 = vmul.f32 %v818_v21, %v795_v6  ;;  %v821_v24 = vperm.slane %v818_v21, 0 }
 0x2bf   : > { %v820_v25 = vsub.f32 %v788_v22, %v819_v23  ;;  %v822_v26 = vmul.f32 %v821_v24, %v783_v55 }
 0x2c1   : > { %v823_v27 = vperm.slane %v820_v25, 0 }
 0x2c3   : > { %v824_v28 = vadd.f32 %v823_v27, %v822_v26 }
 0x2c5   : > { %v825_v29 = vadd.f32 %v824_v28, %v1916_v63  ;;  %831 = sbr.rel (%p1177_p1) target bundleno = 880 (0x370), region = 88 }
 0x2c7   : > { %v826_v30 = vmax.f32 %v825_v29, 0.0 }
 0x2c9   : > { %827 = vst [vmem:[#allocation2] sm:$0xff] %v826_v30 }
 0x2ca   : > { %v1247_v31 = vld [vmem:[#allocation14 + $0x38] sm:$0xff]  ;;  %v1246_v32 = vld [vmem:[#allocation14 + $0x30] sm:$0xff]  ;;  %v1245_v33 = vld [vmem:[#allocation14 + $0x28] sm:$0xff]  ;;  %v832_v38 = vpack.c.bf16 %v826_v30, %v826_v30 }
 0x2cb   : > { %901 = vmatpush.bf16.msra.mxu0 %v1247_v31  ;;  %v1244_v34 = vld [vmem:[#allocation14 + $0x20] sm:$0xff]  ;;  %v1243_v35 = vld [vmem:[#allocation14 + $0x18] sm:$0xff]  ;;  %v1242_v36 = vld [vmem:[#allocation14 + $0x10] sm:$0xff] }
 0x2cc   : > { %v1241_v37 = vld [vmem:[#allocation14 + $0x8] sm:$0xff]  ;;  %v1240_v63 = vld [vmem:[#allocation14] sm:$0xff] }
 0x2cd   : > { %v1359_v39 = vld [vmem:[%s1961_s7] ss:$0 sm:$0xff] }
 0x2cf   : > { %902 = vmatpush.bf16.msra.mxu0 %v1246_v32 }
 0x2d3   : > { %903 = vmatpush.bf16.msra.mxu0 %v1245_v33 }
 0x2d7   : > { %904 = vmatpush.bf16.msra.mxu0 %v1244_v34 }
 0x2db   : > { %905 = vmatpush.bf16.msra.mxu0 %v1243_v35 }
 0x2df   : > { %906 = vmatpush.bf16.msra.mxu0 %v1242_v36 }
 0x2e3   : > { %907 = vmatpush.bf16.msra.mxu0 %v1241_v37 }
 0x2e7   : > { %908 = vmatpush.bf16.msra.mxu0 %v1240_v63 }
 0x2ea   : > { %909 = vmatmul.bf16.vlgmr.msra.gmra.mxu0 %v832_v38 }
 0x367   : > { %v910_v40 = vpop.f32.mrf.mxu0 }
 0x368   : > { %v911_v41 = vadd.f32 %v1359_v39, %v910_v40 }
 0x36a   : > { %914 = vst [vmem:[#allocation15] sm:$0xff] %v911_v41 }
 0x36f   : > { %v912_v42 = vpop.f32.mrf.mxu0 }
 0x370 PF: > { %p1306_p4 = scmp.eq.s32.totalorder %s1727_s9, 2  ;;  %s1662_s12 = smov [#allocation15]  }
 0x371   : > { %s921_s22 = sshll.u32 %s1662_s12, 4  ;;  %s923_s17 = sshll.u32 %s1962_s8, 4  ;;  %s922_s22 = int_to_ptr.vmem [resolvable:$true] %s921_s22  ;;  %s924_s17 = int_to_ptr.hbm [resolvable:$true] %s923_s17 }
 0x372   : > { %1271 = dma.vmem_to_hbm [thread:$0]  (%p1306_p4), %s922_s22, 128, %s924_s17, [#allocation5]  }
 0x373   : > { %1635 = dma.done.wait (%p1306_p4), [#allocation5], 128  }
 0x374   : > { %1637 = vsyncadd (%p1306_p4), [#allocation5], 4294967168 }
 0x375 PF: > { %s1988_s11 = sld [smem:[#allocation22_spill]]  ;;  %p24_p5 = scmp.ge.s32.totalorder %s1769_s25, 5  }
 0x376   : > { %s1989_s27 = smov %s1644_s28  ;;  %s1990_s28 = smov %s1648_s29 }
 0x377   : > { %s1992_s30 = smov %s1769_s25  ;;  %26 = sbr.rel (!%p24_p5) target bundleno = 12 (0xc), region = 138 }
 0x37b   : > { %s1991_s29 = smov %s1988_s11 }
 0x37c   :  { %937 = vsyncpa [#allocation4], 1 }
 0x37d   :  { %939 = vsyncpa [#allocation4 + $0x1], 1 }
 0x37e   :  { %940 = vsyncpa [#allocation7], 1 }
 0x37f   :  { %941 = vsyncpa [#allocation10], 1 }
 0x380   :  { %943 = vsyncpa [#allocation10 + $0x1], 1 }
 0x381   :  { %944 = vsyncpa [#allocation13], 1 }
 0x382   :  { %946 = vsyncpa [#allocation13 + $0x1], 1 }
 0x383   :  { %947 = vsyncpa [#allocation5], 1 }
 0x384   :  { %949 = vsyncpa [#allocation5 + $0x1], 1 }

</bundles_post_ra>
